<compile_context>
chip_gen: v7x
topology: tpu7x:2x2x1
jax: 0.10.0
libtpu: 0.0.40
codegen_flags: <defaults>
</compile_context>

<pallas_src>
import functools
import math

import jax
import jax.numpy as jnp
from jax import lax
from jax.experimental import pallas as pl
from jax.experimental.pallas import tpu as pltpu


def _round_up(n, m):
    return ((n + m - 1) // m) * m


def _sinusoidal_kernel_fused(x_ref, out_ref, *, half_dim, scale):
    """half_dim % 128 != 0 path: one full-width lane-dense store.

    cos(t) = sin(t + pi/2); frequency table is tiled twice along lanes so every
    lane of the (TB, dim) output tile is produced by a single sin evaluation.
    """
    dim = 2 * half_dim
    lane = lax.broadcasted_iota(jnp.int32, (1, dim), 1)
    freq_idx = jnp.where(lane < half_dim, lane, lane - half_dim).astype(jnp.float32)
    freqs = jnp.exp(freq_idx * (-scale))                     # (1, dim), tiled x2
    phase = jnp.where(lane < half_dim, jnp.float32(0.0),
                      jnp.float32(math.pi / 2.0))            # cos = sin(.+pi/2)
    args = x_ref[...] * freqs + phase                        # (TB, dim), VPU
    out_ref[...] = jnp.sin(args).astype(out_ref.dtype)       # one dense vst stream


def _sinusoidal_kernel_split(x_ref, out_ref, *, half_dim, scale):
    """half_dim % 128 == 0 path: both half-stores are already lane-aligned and
    dense, so keep exact jnp.sin / jnp.cos with two slice stores."""
    idx = lax.broadcasted_iota(jnp.int32, (1, half_dim), 1).astype(jnp.float32)
    freqs = jnp.exp(idx * (-scale))                          # (1, half_dim)
    args = x_ref[...] * freqs                                # (TB, half_dim)
    out_ref[:, :half_dim] = jnp.sin(args).astype(out_ref.dtype)
    out_ref[:, half_dim:] = jnp.cos(args).astype(out_ref.dtype)


def _choose_batch_tile(b, dim, out_itemsize):
    """Pick the batch tile TB (multiple of 8, or == b for tiny b)."""
    if b <= 8:
        return b                                  # single full block (== array dim)
    b8 = _round_up(b, 8)
    out_row = dim * out_itemsize                  # one output row in VMEM
    in_row = 128 * 4                              # (TB,1) f32 block lane-pads to 128 lanes
    # Double-buffered in+out tiles must fit v5e's 16 MiB default scoped VMEM
    # (leave ~4 MiB headroom); v6e/v7x defaults (32 MiB) are strictly larger.
    vmem_rows = (12 * 1024 * 1024) // (2 * (out_row + in_row))
    # Target >= ~2 MiB of output per grid step so the ~0.35 us per-step overhead
    # stays <~15% even against v7x's 3.2 TB/s HBM.
    target_rows = max(8, (2 * 1024 * 1024) // out_row)
    tb = max(8, min(b8, vmem_rows, target_rows))
    tb = max(8, (tb // 8) * 8)
    # v7x megacore: make sure the "parallel" axis has >= 2 grid steps so both
    # TensorCores get work (no-op on single-TC v5e/v6e). This branch only fires
    # when tb == b8, i.e. halving still fits the VMEM / tile-size budgets above.
    if pl.cdiv(b, tb) < 2:
        tb = max(8, _round_up(pl.cdiv(b8, 2), 8))
    return tb


def sinusoidal_pos_emb(x, dim, *, out_dtype=jnp.float32):
    """Pallas equivalent of SinusoidalPosEmb(dim)(x).

    Args:
      x:         (B,) array of positions / timesteps (any numeric dtype).
      dim:       embedding dimension; output is (B, dim) of dtype `out_dtype`.
      out_dtype: float32 (default, matches PyTorch) or bfloat16 to halve the
                 output HBM traffic when the consumer runs in bf16.
    """
    assert dim % 2 == 0, "dim must be even (sin/cos split)"
    assert dim > 2, "dim must be > 2 (half_dim - 1 would be zero)"
    half_dim = dim // 2
    scale = math.log(10000.0) / (half_dim - 1)

    b = x.shape[0]
    out_itemsize = jnp.dtype(out_dtype).itemsize
    tb = _choose_batch_tile(b, dim, out_itemsize)
    grid = (pl.cdiv(b, tb),)                      # ragged: no pad, no post-slice

    x2d = x.astype(jnp.float32).reshape(b, 1)

    kernel = (_sinusoidal_kernel_split if half_dim % 128 == 0
              else _sinusoidal_kernel_fused)
    # TODO(synk): for dim <= 64 a row-folding layout (view output as
    # (b*dim//128, 128)) would restore full lane occupancy; not implemented.

    return pl.pallas_call(
        functools.partial(kernel, half_dim=half_dim, scale=scale),
        out_shape=jax.ShapeDtypeStruct((b, dim), out_dtype),
        grid=grid,
        in_specs=[pl.BlockSpec((tb, 1), lambda i: (i, 0))],
        out_specs=pl.BlockSpec((tb, dim), lambda i: (i, 0)),
        compiler_params=pltpu.CompilerParams(
            dimension_semantics=("parallel",),
        ),
        cost_estimate=pl.CostEstimate(
            flops=2 * b * dim,
            transcendentals=b * dim,
            bytes_accessed=b * 4 + b * dim * out_itemsize,
        ),
    )(x2d)


def _reference(x, dim, out_dtype=jnp.float32):
    half_dim = dim // 2
    scale = math.log(10000.0) / (half_dim - 1)
    freqs = jnp.exp(jnp.arange(half_dim, dtype=jnp.float32) * -scale)
    args = x.astype(jnp.float32)[:, None] * freqs[None, :]
    return jnp.concatenate([jnp.sin(args), jnp.cos(args)], axis=-1).astype(out_dtype)


if __name__ == "__main__":
    key = jax.random.PRNGKey(0)

    # 1) Small primary case (dim=32 -> fused lane-dense path, single block).
    B, DIM = 8, 32
    x = jax.random.uniform(key, (B,), dtype=jnp.float32, minval=0.0, maxval=1000.0)
    emb = jax.block_until_ready(sinusoidal_pos_emb(x, DIM))
    ref = _reference(x, DIM)
    assert emb.shape == (B, DIM), emb.shape
    assert emb.dtype == jnp.float32, emb.dtype
    # fused cos = sin(arg + pi/2): ~3e-5 abs worst case for args up to ~1000.
    assert jnp.allclose(emb, ref, atol=2e-4, rtol=1e-5), "mismatch vs reference (dim=32)"

    # 2) dim=128 (half_dim=64 -> fused path), integer timesteps, multi-step grid
    #    with a partial edge block (no pad / no post-slice).
    B2, DIM2 = 200, 128
    steps2 = jax.random.randint(jax.random.PRNGKey(1), (B2,), 0, 1000, dtype=jnp.int32)
    emb2 = jax.block_until_ready(sinusoidal_pos_emb(steps2, DIM2))
    ref2 = _reference(steps2, DIM2)
    assert emb2.shape == (B2, DIM2), emb2.shape
    assert jnp.allclose(emb2, ref2, atol=2e-4, rtol=1e-5), "mismatch vs reference (dim=128)"

    # 3) dim=256 (half_dim=128 -> exact aligned two-store path), B not a
    #    multiple of 8, ragged edge block.
    B3, DIM3 = 530, 256
    steps3 = jax.random.randint(jax.random.PRNGKey(2), (B3,), 0, 1000, dtype=jnp.int32)
    emb3 = jax.block_until_ready(sinusoidal_pos_emb(steps3, DIM3))
    ref3 = _reference(steps3, DIM3)
    assert emb3.shape == (B3, DIM3), emb3.shape
    assert jnp.allclose(emb3, ref3, atol=1e-5, rtol=1e-5), "mismatch vs reference (dim=256)"

    # 4) bf16 output option (compute in f32, cast only at the store).
    emb_bf = jax.block_until_ready(sinusoidal_pos_emb(x, DIM, out_dtype=jnp.bfloat16))
    assert emb_bf.dtype == jnp.bfloat16
    assert jnp.allclose(emb_bf.astype(jnp.float32), ref, atol=1e-2, rtol=1e-2)

    print("KERNEL_OK")
</pallas_src>

<mosaic_0001>
module attributes {stable_mosaic.version = 11 : i64} {
  func.func @_sinusoidal_kernel_fused(%arg0: i32, %arg1: memref<8x1xf32, #tpu.memory_space<vmem>>, %arg2: memref<8x32xf32, #tpu.memory_space<vmem>>) attributes {dimension_semantics = [#tpu.dimension_semantics<parallel>], iteration_bounds = array<i64: 1>, scalar_prefetch = 0 : i64, scratch_operands = 0 : i64, tpu.core_type = #tpu.core_type<tc>, window_params = [{transform_indices = @transform_0, window_bounds = array<i64: 8, 1>}, {transform_indices = @transform_1, window_bounds = array<i64: 8, 32>}]} {
    %0 = tpu.iota {dimensions = array<i32: 1>} : vector<1x32xi32>
    %c16_i32 = arith.constant 16 : i32
    %1 = vector.broadcast %c16_i32 : i32 to vector<1x32xi32>
    %2 = arith.cmpi slt, %0, %1 : vector<1x32xi32>
    %c16_i32_0 = arith.constant 16 : i32
    %3 = vector.broadcast %c16_i32_0 : i32 to vector<1x32xi32>
    %4 = arith.subi %0, %3 : vector<1x32xi32>
    %5 = arith.select %2, %0, %4 : vector<1x32xi1>, vector<1x32xi32>
    %6 = arith.sitofp %5 : vector<1x32xi32> to vector<1x32xf32>
    %cst = arith.constant -0.614022672 : f32
    %7 = vector.broadcast %cst : f32 to vector<1x32xf32>
    %8 = arith.mulf %6, %7 : vector<1x32xf32>
    %9 = math.exp %8 : vector<1x32xf32>
    %c16_i32_1 = arith.constant 16 : i32
    %10 = vector.broadcast %c16_i32_1 : i32 to vector<1x32xi32>
    %11 = arith.cmpi slt, %0, %10 : vector<1x32xi32>
    %cst_2 = arith.constant 0.000000e+00 : f32
    %cst_3 = arith.constant 1.57079637 : f32
    %12 = vector.broadcast %cst_2 : f32 to vector<1x32xf32>
    %13 = vector.broadcast %cst_3 : f32 to vector<1x32xf32>
    %14 = arith.select %11, %12, %13 : vector<1x32xi1>, vector<1x32xf32>
    %c0 = arith.constant 0 : index
    %c0_4 = arith.constant 0 : index
    %15 = vector.load %arg1[%c0, %c0_4] : memref<8x1xf32, #tpu.memory_space<vmem>>, vector<8x1xf32>
    %16 = vector.broadcast %15 : vector<8x1xf32> to vector<8x32xf32>
    %17 = vector.broadcast %9 : vector<1x32xf32> to vector<8x32xf32>
    %18 = arith.mulf %16, %17 : vector<8x32xf32>
    %19 = vector.broadcast %14 : vector<1x32xf32> to vector<8x32xf32>
    %20 = arith.addf %18, %19 : vector<8x32xf32>
    %21 = math.sin %20 : vector<8x32xf32>
    %c0_5 = arith.constant 0 : index
    %c0_6 = arith.constant 0 : index
    %22 = vector.load %arg2[%c0_5, %c0_6] : memref<8x32xf32, #tpu.memory_space<vmem>>, vector<8x32xf32>
    tpu.vector_store %arg2[%c0_5, %c0_6], %21 {strides = array<i32>} : memref<8x32xf32, #tpu.memory_space<vmem>>, vector<8x32xf32>,
    return
  }
  func.func @transform_0(%arg0: i32) -> (i32, i32) {
    %c0_i32 = arith.constant 0 : i32
    %c0_i32_0 = arith.constant 0 : i32
    return %arg0, %c0_i32 : i32, i32
  }
  func.func @transform_1(%arg0: i32) -> (i32, i32) {
    %c0_i32 = arith.constant 0 : i32
    %c0_i32_0 = arith.constant 0 : i32
    return %arg0, %c0_i32 : i32, i32
  }
}

</mosaic_0001>

<bundles_post_ra>
// kernel: tpu_custom_call.1
= control target key start
LH: loop header
LB: loop body
LE: loop exit
PB: predicated region body
PF: predicated region fallthrough
CT: control target
= control target key end

     0   :  { %v196_v1 = vmov 0   ;;  %s251_s0 = inlined_call_operand.vmem [shape: f32[8,1], index: 0, kind: input, shape index: {}]   ;;  %s252_s1 = inlined_call_operand.hbm [shape: f32[8,32], index: 1, kind: output, shape index: {}]  }
   0x1   :  { %v19_v0 = vld [vmem:[%s251_s0] sm:$0xff]  ;;  %165 = vset.pattern.permute.xlu0 %v196_v1 }
   0x2   :  { %6 = vsyncpa [#allocation3], 0  ;;  %22 = vperm.xlu0 %165, %v19_v0   ;;  %v9_v2 = vlaneseq  ;;  %v197_v11 = vmov 1.5707964   ;;  %v198_v26 = vmov 2102212464  }
   0x3   :  { %v199_v28 = vmov 920167782   ;;  %v200_v32 = vmov 1326507024   ;;  %v201_v34 = vmov 683565275  }
   0x4   :  { %v10_v3 = vand.u32 127, %v9_v2  ;;  %v202_v36 = vmov 2475754826   ;;  %v203_v39 = vmov 2131351028   ;;  %s204_s0 = smov [#allocation2]  }
   0x5   :  { %s139_s8 = sshll.u32 %s204_s0, 4  ;;  %vm131_vm13 = vcmask 261120   ;;  %s140_s8 = int_to_ptr.vmem [resolvable:$true] %s139_s8 }
   0x6   :  { %v147_v4 = vadd.s32 4294967280, %v10_v3  ;;  %vm11_vm0 = vcmp.lt.s32.totalorder %v10_v3, 16  ;;  %s172_s9 = scalar_lea.vmem %s140_s8, 128  ;;  %p177_p1 = scmp.lt.s32.totalorder %s140_s8, %s140_s8 }
   0x7   :  { %v18_v12 = vsel %vm11_vm0, 0.0, %v197_v11  ;;  %p173_p0 = scmp.ne.s32.totalorder %s140_s8, %s172_s9  ;;  %p178_p2 = scmp.lt.s32.totalorder %s172_s9, %s172_s9 }
   0x8   :  { %v13_v5 = vsel %vm11_vm0, %v10_v3, %v147_v4 }
   0x9   :  { %v14_v6 = vcvt.s32.f32 %v13_v5  ;;  %p179_p3 = por %p178_p2, %p177_p1 }
   0xb   :  { %v15_v7 = vmul.f32 -0.6140227, %v14_v6  ;;  %p180_p4 = pnand %p179_p3, %p173_p0 }
   0xd   :  { %v16_v8 = vmul.f32 1.442695, %v15_v7 }
   0xf   :  { %166 = vpow2.f32 %v16_v8 }
  0x19   :  { %v167_v9 = vpop.eup %166 }
  0x81   :  { %v23_v10 = vpop.permute.xlu0 %22 }
  0x82   :  { %v25_v13 = vmul.f32 %v167_v9, %v23_v10 }
  0x84   :  { %v218_v14 = vadd.f32 %v25_v13, %v18_v12 }
  0x86   :  { %v30_v15 = vand.u32 2139095040, %v218_v14  ;;  %v27_v16 = vand.u32 2147483647, %v218_v14  ;;  %vm29_vm8 = vcmp.lt.s32.totalorder %v218_v14, 0  ;;  %vm119_vm14 = vweird.f32 %v218_v14 }
  0x88   :  { %v31_v17 = vshrl.u32 %v30_v15, 23  ;;  %v34_v19 = vand.u32 8388607, %v27_v16  ;;  %vm28_vm9 = vcmp.le.f32.partialorder %v27_v16, 0.7853982 }
  0x8a   :  { %v148_v18 = vadd.s32 4294967169, %v31_v17  ;;  %v35_v22 = vor.u32 8388608, %v34_v19 }
  0x8c   :  { %v37_v20 = vadd.s32 1, %v148_v18  ;;  %v75_v30 = vshll.u32 %v35_v22, 8 }
  0x8e   :  { %vm38_vm1 = vcmp.gt.s32.totalorder %v37_v20, 0 }
  0x8f   :  { %v39_v21 = vsel %vm38_vm1, %v37_v20, 0 }
  0x90   :  { %v41_v23 = vand.u32 31, %v39_v21  ;;  %v40_v24 = vshrl.u32 %v39_v21, 5 }
  0x92   :  { %v42_v25 = vsub.s32 32, %v41_v23  ;;  %v53_v27 = vshll.u32 %v198_v26, %v41_v23  ;;  %v56_v29 = vshll.u32 %v199_v28, %v41_v23  ;;  %v44_v35 = vshll.u32 %v201_v34, %v41_v23 }
  0x93   :  { %v47_v38 = vshll.u32 %v202_v36, %v41_v23  ;;  %v50_v41 = vshll.u32 %v203_v39, %v41_v23  ;;  %vm62_vm2 = vcmp.lt.s32.totalorder %v40_v24, 4  ;;  %vm59_vm3 = vcmp.lt.s32.totalorder %v40_v24, 1 }
  0x94   :  { %v54_v31 = vshrl.u32 %v199_v28, %v42_v25  ;;  %v57_v33 = vshrl.u32 %v200_v32, %v42_v25  ;;  %v45_v37 = vshrl.u32 %v202_v36, %v42_v25  ;;  %v48_v40 = vshrl.u32 %v203_v39, %v42_v25 }
  0x95   :  { %v51_v42 = vshrl.u32 %v198_v26, %v42_v25  ;;  %v43_v46 = vshrl.u32 %v201_v34, %v42_v25  ;;  %vm60_vm4 = vcmp.lt.s32.totalorder %v40_v24, 2  ;;  %vm61_vm5 = vcmp.lt.s32.totalorder %v40_v24, 3 }
  0x96   :  { %v55_v43 = vor.u32 %v54_v31, %v53_v27  ;;  %v58_v44 = vor.u32 %v57_v33, %v56_v29  ;;  %v46_v45 = vor.u32 %v45_v37, %v44_v35  ;;  %v49_v47 = vor.u32 %v48_v40, %v47_v38 }
  0x97   :  { %v52_v48 = vor.u32 %v51_v42, %v50_v41 }
  0x98   :  { %v68_v49 = vsel %vm62_vm2, %v55_v43, 920167782  ;;  %v72_v50 = vsel %vm62_vm2, %v58_v44, 1326507024  ;;  %v67_v52 = vsel %vm59_vm3, %v46_v45, %v49_v47  ;;  %v63_v55 = vsel %vm59_vm3, %v43_v46, %v46_v45 }
  0x99   :  { %v64_v51 = vsel %vm62_vm2, %v52_v48, 2102212464  ;;  %v69_v53 = vsel %vm61_vm5, %v52_v48, %v68_v49  ;;  %v71_v54 = vsel %vm59_vm3, %v49_v47, %v52_v48  ;;  %v73_v58 = vsel %vm61_vm5, %v55_v43, %v72_v50 }
  0x9a   :  { %v65_v56 = vsel %vm61_vm5, %v49_v47, %v64_v51  ;;  %v70_v57 = vsel %vm60_vm4, %v67_v52, %v69_v53  ;;  %v74_v59 = vsel %vm60_vm4, %v71_v54, %v73_v58 }
  0x9b   :  { %v224_v60 = vmul.u32.u64.low %v75_v30, %v70_v57  ;;  %v225_v61 = vmul.u32.u64.high %v75_v30, %v70_v57, %v224_v60  ;;  %v227_v62 = vmul.u32.u64.low %v75_v30, %v74_v59  ;;  %v228_v63 = vmul.u32.u64.high %v75_v30, %v74_v59, %v227_v62 }
  0x9c   :  { %v66_v0 = vsel %vm60_vm4, %v63_v55, %v65_v56 }
  0x9d   :  { %v85_v1 = vadd.s32 1, %v225_v61  ;;  %v82_v2 = vmul.u32 %v75_v30, %v66_v0  ;;  %vm84_vm6 = vc.u32 %v228_v63, %v224_v60  ;;  %v83_v15 = vadd.s32 %v224_v60, %v228_v63 }
  0x9f   :  { %v86_v3 = vsel %vm84_vm6, %v85_v1, %v225_v61 }
  0xa0   :  { %v87_v4 = vadd.s32 %v86_v3, %v82_v2 }
  0xa2   :  { %v88_v5 = vadd.s32 536870912, %v87_v4 }
  0xa4   :  { %v89_v6 = vshrl.u32 %v88_v5, 30 }
  0xa6   :  { %v90_v7 = vshll.u32 %v89_v6, 30  ;;  %v113_v28 = vsub.s32 4, %v89_v6 }
  0xa8   :  { %v91_v8 = vsub.s32 %v87_v4, %v90_v7  ;;  %v114_v31 = vsel %vm29_vm8, %v113_v28, %v89_v6 }
  0xa9   :  { %v116_v33 = vsel %vm28_vm9, 0, %v114_v31 }
  0xaa   :  { %v93_v9 = vsub.s32 0, %v91_v8  ;;  %v120_v34 = vadd.s32 3, %v116_v33 }
  0xac   :  { %v149_v10 = vmin.u32 %v93_v9, %v91_v8  ;;  %v121_v35 = vand.u32 3, %v120_v34 }
  0xae   :  { %v95_v11 = vclz %v149_v10  ;;  %vm126_vm10 = vcmp.eq.s32.totalorder %v121_v35, 2  ;;  %vm123_vm11 = vcmp.eq.s32.totalorder %v121_v35, 0  ;;  %vm122_vm12 = vcmp.lt.s32.totalorder %v121_v35, 2 }
  0xb0   :  { %v150_v12 = vadd.s32 4294967294, %v95_v11 }
  0xb2   :  { %vm151_vm7 = vcmp.lt.s32.totalorder %v150_v12, 0 }
  0xb3   :  { %v98_v13 = vsel %vm151_vm7, 0, %v150_v12 }
  0xb4   :  { %v99_v17 = vsub.s32 32, %v98_v13  ;;  %v103_v18 = vsub.s32 4294967266, %v98_v13  ;;  %v100_v19 = vshll.u32 %v91_v8, %v98_v13 }
  0xb6   :  { %v101_v20 = vshrl.u32 %v83_v15, %v99_v17  ;;  %v104_v21 = vadd.s32 127, %v103_v18 }
  0xb8   :  { %v102_v22 = vor.u32 %v101_v20, %v100_v19  ;;  %v105_v23 = vshll.u32 %v104_v21, 23 }
  0xba   :  { %v106_v24 = vor.u32 4788187, %v105_v23  ;;  %v109_v26 = vcvt.s32.f32 %v102_v22 }
  0xbc   :  { %v107_v25 = vand.u32 2147483647, %v106_v24 }
  0xbe   :  { %v110_v27 = vmul.f32 %v109_v26, %v107_v25 }
  0xc0   :  { %v111_v29 = vxor.u32 2147483648, %v110_v27 }
  0xc2   :  { %v112_v30 = vsel %vm29_vm8, %v111_v29, %v110_v27 }
  0xc3   :  { %v115_v32 = vsel %vm28_vm9, %v218_v14, %v112_v30 }
  0xc4   :  { %168 = vcosq.f32 %v115_v32 }
  0xc5   :  { %170 = vsinq.f32 %v115_v32 }
  0xce   :  { %v169_v36 = vpop.eup %168 }
  0xcf   :  { %v171_v37 = vpop.eup %170  ;;  %v127_v38 = vxor.u32 2147483648, %v169_v36 }
  0xd0   :  { %v124_v39 = vxor.u32 2147483648, %v171_v37 }
  0xd1   :  { %v128_v40 = vsel %vm126_vm10, %v127_v38, %v171_v37 }
  0xd2   :  { %v125_v16 = vsel %vm123_vm11, %v169_v36, %v124_v39 }
  0xd3   :  { %v129_v41 = vsel %vm122_vm12, %v125_v16, %v128_v40 }
  0xd4   :  { %v130_v42 = vsel %vm119_vm14, nan, %v129_v41 }
  0xd5   :  { %132 = vst.msk [vmem:[#allocation2] sm:$0xff] %vm131_vm13, %v130_v42 }
  0xd6   :  { %183 = shalt.err (!%p180_p4)
}
  0xd7   :  { %s184_s12 = scalar_lea.hbm %s252_s1, 128 }
  0xd8   :  { %p185_p5 = scmp.ne.s32.totalorder %s252_s1, %s184_s12  ;;  %p188_p6 = scmp.lt.u32.totalorder %s184_s12, %s252_s1 }
  0xda   :  { %p190_p7 = pnand %p188_p6, %p185_p5 }
  0xdc   :  { %193 = shalt.err (!%p190_p7)
}
  0xdd   :  { %142 = dma.vmem_to_hbm [thread:$0]  %s140_s8, 128, %s252_s1, [#allocation3]  }
  0xde   :  { %194 = dma.done.wait [#allocation3], 128  }
  0xdf   :  { %195 = vsyncadd [#allocation3], 4294967168 }
  0xe0   :  { %146 = vsyncpa [#allocation3], 1 }

</bundles_post_ra>
